<compile_context>
chip_gen: v7x
topology: tpu7x:2x2x1
jax: 0.10.0
libtpu: 0.0.40
codegen_flags: <defaults>
</compile_context>

<pallas_src>
import jax
import jax.numpy as jnp
from jax.experimental import pallas as pl
from jax.experimental.pallas import tpu as pltpu

_LANES = 128


def _round_up(x, m):
    return (x + m - 1) // m * m


def _actor_kernel(ma_ref, x_ref, w1_ref, b1_ref, w2_ref, b2_ref, w3_ref,
                  b3_ref, o_ref):
    """One batch tile of the 3-layer tanh MLP.

    bf16 operands feed the MXU; accumulation (preferred_element_type) and the
    bias/tanh/scale math stay in f32. Biases are read once per invocation
    (no inner loop -> no repeated broadcast_in_dim).
    """
    max_action = ma_ref[0, 0]                                   # SMEM scalar
    x = x_ref[...].astype(jnp.bfloat16)
    h1 = jnp.tanh(
        jnp.dot(x, w1_ref[...], preferred_element_type=jnp.float32)
        + b1_ref[...])
    h2 = jnp.tanh(
        jnp.dot(h1.astype(jnp.bfloat16), w2_ref[...],
                preferred_element_type=jnp.float32) + b2_ref[...])
    a = jnp.tanh(
        jnp.dot(h2.astype(jnp.bfloat16), w3_ref[...],
                preferred_element_type=jnp.float32) + b3_ref[...])
    # Full-width (lane-dense, 128-wide) unmasked store.
    o_ref[...] = (a * max_action).astype(o_ref.dtype)


def actor_forward(state, params, max_action, *, tb=2048):
    """state: [B, state_dim] float32. Returns [B, action_dim] float32."""
    w1, b1, w2, b2, w3, b3 = params
    B, state_dim = state.shape
    hidden = w1.shape[1]
    action_dim = w3.shape[1]

    # Batch tile: multiple of 8 sublanes; default 2048 rows is sized against
    # v7x's 64 MiB physical / 32 MiB scoped VMEM (also fine on v5e/v6e).
    tb = max(8, _round_up(min(tb, B), 8))
    b_pad = _round_up(B, tb)
    if b_pad != B:
        state = jnp.pad(state, ((0, b_pad - B), (0, 0)))

    # Lane-dense output: pad the last layer to a 128-wide output slab so the
    # final matmul/store are unmasked; slice [:, :action_dim] afterwards.
    n_out = _round_up(action_dim, _LANES)
    w3p = jnp.pad(w3, ((0, 0), (0, n_out - action_dim))).astype(jnp.bfloat16)
    b3p = jnp.pad(b3, ((0, 0), (0, n_out - action_dim)))

    # bf16 weights for the MXU (halves weight HBM traffic); biases stay f32.
    w1b = w1.astype(jnp.bfloat16)
    w2b = w2.astype(jnp.bfloat16)

    # Runtime scalar in SMEM -> no recompile for different max_action values.
    ma = jnp.full((1, 1), float(max_action), dtype=jnp.float32)

    grid = (b_pad // tb,)

    def whole(shape):
        # Whole-array block; block index never changes across the batch grid,
        # so Pallas keeps it VMEM-resident (no per-step re-DMA).
        return pl.BlockSpec(shape, lambda i: (0, 0))

    cost = pl.CostEstimate(
        flops=2 * b_pad * (state_dim * hidden + hidden * hidden
                           + hidden * n_out),
        transcendentals=b_pad * (hidden + hidden + n_out),
        bytes_accessed=(b_pad * (state_dim + n_out) * 4
                        + (w1b.size + w2b.size + w3p.size) * 2
                        + (b1.size + b2.size + b3p.size) * 4),
    )

    out = pl.pallas_call(
        _actor_kernel,
        out_shape=jax.ShapeDtypeStruct((b_pad, n_out), jnp.float32),
        grid=grid,
        in_specs=[
            pl.BlockSpec((1, 1), lambda i: (0, 0),
                         memory_space=pltpu.SMEM),              # max_action
            pl.BlockSpec((tb, state_dim), lambda i: (i, 0)),    # state tile
            whole(w1b.shape), whole(b1.shape),                  # layer 1
            whole(w2b.shape), whole(b2.shape),                  # layer 2
            whole(w3p.shape), whole(b3p.shape),                 # layer 3 (padded)
        ],
        out_specs=pl.BlockSpec((tb, n_out), lambda i: (i, 0)),
        compiler_params=pltpu.CompilerParams(
            dimension_semantics=("parallel",),   # 2 TCs on v7x; no-op on v5e/v6e
            vmem_limit_bytes=32 * 1024 * 1024,
        ),
        cost_estimate=cost,
    )(ma, state, w1b, b1, w2b, b2, w3p, b3p)

    return out[:B, :action_dim]


def init_actor_params(key, state_dim, action_dim, hidden=64):
    """Deterministic init matching torch.nn.Linear default:
    U(-1/sqrt(fan_in), 1/sqrt(fan_in)) for both weight and bias."""
    keys = jax.random.split(key, 6)

    def linear(kw, kb, fan_in, fan_out):
        bound = 1.0 / jnp.sqrt(jnp.float32(fan_in))
        w = jax.random.uniform(kw, (fan_in, fan_out), jnp.float32,
                               minval=-bound, maxval=bound)
        b = jax.random.uniform(kb, (1, fan_out), jnp.float32,
                               minval=-bound, maxval=bound)
        return w, b

    w1, b1 = linear(keys[0], keys[1], state_dim, hidden)
    w2, b2 = linear(keys[2], keys[3], hidden, hidden)
    w3, b3 = linear(keys[4], keys[5], hidden, action_dim)
    return (w1, b1, w2, b2, w3, b3)


def actor_reference(state, params, max_action):
    """Pure-JAX f32 reference for correctness checking."""
    w1, b1, w2, b2, w3, b3 = params
    h1 = jnp.tanh(state @ w1 + b1)
    h2 = jnp.tanh(h1 @ w2 + b2)
    return jnp.tanh(h2 @ w3 + b3) * max_action


if __name__ == "__main__":
    # Small, module-consistent shapes: batch=8 states of dim 16, 4-dim action.
    batch = 8
    state_dim = 16
    action_dim = 4
    max_action = 2.0

    key = jax.random.PRNGKey(0)
    k_params, k_state = jax.random.split(key)

    params = init_actor_params(k_params, state_dim, action_dim)
    state = jax.random.normal(k_state, (batch, state_dim), jnp.float32)

    out = actor_forward(state, params, max_action)
    out = jax.block_until_ready(out)

    ref = actor_reference(state, params, max_action)
    assert out.shape == (batch, action_dim)
    # Matmul operands are bf16 (f32 accumulation) -> loosened tolerance vs
    # the pure-f32 reference.
    assert jnp.allclose(out, ref, atol=2e-2, rtol=2e-2), "mismatch vs reference"

    print("KERNEL_OK")
</pallas_src>

<mosaic_0001>
module attributes {stable_mosaic.version = 11 : i64} {
  func.func @_actor_kernel(%arg0: i32, %arg1: memref<1x1xf32, #tpu.memory_space<smem>>, %arg2: memref<8x16xf32, #tpu.memory_space<vmem>>, %arg3: memref<16x64xbf16, #tpu.memory_space<vmem>>, %arg4: memref<1x64xf32, #tpu.memory_space<vmem>>, %arg5: memref<64x64xbf16, #tpu.memory_space<vmem>>, %arg6: memref<1x64xf32, #tpu.memory_space<vmem>>, %arg7: memref<64x128xbf16, #tpu.memory_space<vmem>>, %arg8: memref<1x128xf32, #tpu.memory_space<vmem>>, %arg9: memref<8x128xf32, #tpu.memory_space<vmem>>) attributes {dimension_semantics = [#tpu.dimension_semantics<parallel>], iteration_bounds = array<i64: 1>, scalar_prefetch = 0 : i64, scratch_operands = 0 : i64, tpu.core_type = #tpu.core_type<tc>, window_params = [{transform_indices = @transform_0, window_bounds = array<i64: 1, 1>}, {transform_indices = @transform_1, window_bounds = array<i64: 8, 16>}, {pipeline_mode = #tpu.pipeline_mode<synchronous>, transform_indices = @transform_2, window_bounds = array<i64: 16, 64>}, {pipeline_mode = #tpu.pipeline_mode<synchronous>, transform_indices = @transform_3, window_bounds = array<i64: 1, 64>}, {pipeline_mode = #tpu.pipeline_mode<synchronous>, transform_indices = @transform_4, window_bounds = array<i64: 64, 64>}, {pipeline_mode = #tpu.pipeline_mode<synchronous>, transform_indices = @transform_5, window_bounds = array<i64: 1, 64>}, {pipeline_mode = #tpu.pipeline_mode<synchronous>, transform_indices = @transform_6, window_bounds = array<i64: 64, 128>}, {pipeline_mode = #tpu.pipeline_mode<synchronous>, transform_indices = @transform_7, window_bounds = array<i64: 1, 128>}, {transform_indices = @transform_8, window_bounds = array<i64: 8, 128>}]} {
    %c0 = arith.constant 0 : index
    %c0_0 = arith.constant 0 : index
    %0 = memref.load %arg1[%c0, %c0_0] : memref<1x1xf32, #tpu.memory_space<smem>>
    %c0_1 = arith.constant 0 : index
    %c0_2 = arith.constant 0 : index
    %1 = vector.load %arg2[%c0_1, %c0_2] : memref<8x16xf32, #tpu.memory_space<vmem>>, vector<8x16xf32>
    %2 = arith.truncf %1 : vector<8x16xf32> to vector<8x16xbf16>
    %c0_3 = arith.constant 0 : index
    %c0_4 = arith.constant 0 : index
    %3 = vector.load %arg3[%c0_3, %c0_4] : memref<16x64xbf16, #tpu.memory_space<vmem>>, vector<16x64xbf16>
    %cst = arith.constant dense<0.000000e+00> : vector<8x64xf32>
    %4 = tpu.matmul %2, %3, %cst {dimension_numbers = #tpu.dot_dimension_numbers<[1], [0], [0], [1], [0, 0, 1, 1], [], []>} : vector<8x16xbf16>, vector<16x64xbf16>, vector<8x64xf32> -> vector<8x64xf32>
    %c0_5 = arith.constant 0 : index
    %c0_6 = arith.constant 0 : index
    %5 = vector.load %arg4[%c0_5, %c0_6] : memref<1x64xf32, #tpu.memory_space<vmem>>, vector<1x64xf32>
    %6 = vector.broadcast %5 : vector<1x64xf32> to vector<8x64xf32>
    %7 = arith.addf %4, %6 : vector<8x64xf32>
    %8 = math.tanh %7 : vector<8x64xf32>
    %9 = arith.truncf %8 : vector<8x64xf32> to vector<8x64xbf16>
    %c0_7 = arith.constant 0 : index
    %c0_8 = arith.constant 0 : index
    %10 = vector.load %arg5[%c0_7, %c0_8] : memref<64x64xbf16, #tpu.memory_space<vmem>>, vector<64x64xbf16>
    %cst_9 = arith.constant dense<0.000000e+00> : vector<8x64xf32>
    %11 = tpu.matmul %9, %10, %cst_9 {dimension_numbers = #tpu.dot_dimension_numbers<[1], [0], [0], [1], [0, 0, 1, 1], [], []>} : vector<8x64xbf16>, vector<64x64xbf16>, vector<8x64xf32> -> vector<8x64xf32>
    %c0_10 = arith.constant 0 : index
    %c0_11 = arith.constant 0 : index
    %12 = vector.load %arg6[%c0_10, %c0_11] : memref<1x64xf32, #tpu.memory_space<vmem>>, vector<1x64xf32>
    %13 = vector.broadcast %12 : vector<1x64xf32> to vector<8x64xf32>
    %14 = arith.addf %11, %13 : vector<8x64xf32>
    %15 = math.tanh %14 : vector<8x64xf32>
    %16 = arith.truncf %15 : vector<8x64xf32> to vector<8x64xbf16>
    %c0_12 = arith.constant 0 : index
    %c0_13 = arith.constant 0 : index
    %17 = vector.load %arg7[%c0_12, %c0_13] : memref<64x128xbf16, #tpu.memory_space<vmem>>, vector<64x128xbf16>
    %cst_14 = arith.constant dense<0.000000e+00> : vector<8x128xf32>
    %18 = tpu.matmul %16, %17, %cst_14 {dimension_numbers = #tpu.dot_dimension_numbers<[1], [0], [0], [1], [0, 0, 1, 1], [], []>} : vector<8x64xbf16>, vector<64x128xbf16>, vector<8x128xf32> -> vector<8x128xf32>
    %c0_15 = arith.constant 0 : index
    %c0_16 = arith.constant 0 : index
    %19 = vector.load %arg8[%c0_15, %c0_16] : memref<1x128xf32, #tpu.memory_space<vmem>>, vector<1x128xf32>
    %20 = vector.broadcast %19 : vector<1x128xf32> to vector<8x128xf32>
    %21 = arith.addf %18, %20 : vector<8x128xf32>
    %22 = math.tanh %21 : vector<8x128xf32>
    %23 = vector.broadcast %0 : f32 to vector<8x128xf32>
    %24 = arith.mulf %22, %23 : vector<8x128xf32>
    %c0_17 = arith.constant 0 : index
    %c0_18 = arith.constant 0 : index
    %25 = vector.load %arg9[%c0_17, %c0_18] : memref<8x128xf32, #tpu.memory_space<vmem>>, vector<8x128xf32>
    tpu.vector_store %arg9[%c0_17, %c0_18], %24 {strides = array<i32>} : memref<8x128xf32, #tpu.memory_space<vmem>>, vector<8x128xf32>,
    return
  }
  func.func @transform_0(%arg0: i32) -> (i32, i32) {
    %c0_i32 = arith.constant 0 : i32
    %c0_i32_0 = arith.constant 0 : i32
    %c0_i32_1 = arith.constant 0 : i32
    return %c0_i32, %c0_i32_0 : i32, i32
  }
  func.func @transform_1(%arg0: i32) -> (i32, i32) {
    %c0_i32 = arith.constant 0 : i32
    %c0_i32_0 = arith.constant 0 : i32
    return %arg0, %c0_i32 : i32, i32
  }
  func.func @transform_2(%arg0: i32) -> (i32, i32) {
    %c0_i32 = arith.constant 0 : i32
    %c0_i32_0 = arith.constant 0 : i32
    %c0_i32_1 = arith.constant 0 : i32
    return %c0_i32, %c0_i32_0 : i32, i32
  }
  func.func @transform_3(%arg0: i32) -> (i32, i32) {
    %c0_i32 = arith.constant 0 : i32
    %c0_i32_0 = arith.constant 0 : i32
    %c0_i32_1 = arith.constant 0 : i32
    return %c0_i32, %c0_i32_0 : i32, i32
  }
  func.func @transform_4(%arg0: i32) -> (i32, i32) {
    %c0_i32 = arith.constant 0 : i32
    %c0_i32_0 = arith.constant 0 : i32
    %c0_i32_1 = arith.constant 0 : i32
    return %c0_i32, %c0_i32_0 : i32, i32
  }
  func.func @transform_5(%arg0: i32) -> (i32, i32) {
    %c0_i32 = arith.constant 0 : i32
    %c0_i32_0 = arith.constant 0 : i32
    %c0_i32_1 = arith.constant 0 : i32
    return %c0_i32, %c0_i32_0 : i32, i32
  }
  func.func @transform_6(%arg0: i32) -> (i32, i32) {
    %c0_i32 = arith.constant 0 : i32
    %c0_i32_0 = arith.constant 0 : i32
    %c0_i32_1 = arith.constant 0 : i32
    return %c0_i32, %c0_i32_0 : i32, i32
  }
  func.func @transform_7(%arg0: i32) -> (i32, i32) {
    %c0_i32 = arith.constant 0 : i32
    %c0_i32_0 = arith.constant 0 : i32
    %c0_i32_1 = arith.constant 0 : i32
    return %c0_i32, %c0_i32_0 : i32, i32
  }
  func.func @transform_8(%arg0: i32) -> (i32, i32) {
    %c0_i32 = arith.constant 0 : i32
    %c0_i32_0 = arith.constant 0 : i32
    return %arg0, %c0_i32 : i32, i32
  }
}

</mosaic_0001>

<bundles_post_ra>
// kernel: tpu_custom_call.1
= control target key start
LH: loop header
LB: loop body
LE: loop exit
PB: predicated region body
PF: predicated region fallthrough
CT: control target
= control target key end

     0   :  { %14 = vsyncpa [#allocation4], 0  ;;  %s673_s0 = inlined_call_operand.<no memory space> [shape: f32[1,1], index: 0, kind: input, shape index: {}]   ;;  %s674_s1 = inlined_call_operand.hbm [shape: f32[8,16], index: 1, kind: input, shape index: {}]   ;;  %s675_s2 = inlined_call_operand.hbm [shape: bf16[16,64], index: 2, kind: input, shape index: {}]   ;;  %s676_s3 = inlined_call_operand.vmem [shape: f32[1,64], index: 3, kind: input, shape index: {}]   ;;  %s677_s4 = inlined_call_operand.hbm [shape: bf16[64,64], index: 4, kind: input, shape index: {}]   ;;  %s678_s5 = inlined_call_operand.vmem [shape: f32[1,64], index: 5, kind: input, shape index: {}]   ;;  %s679_s6 = inlined_call_operand.hbm [shape: bf16[64,128], index: 6, kind: input, shape index: {}]   ;;  %s680_s7 = inlined_call_operand.vmem [shape: f32[1,128], index: 7, kind: input, shape index: {}]   ;;  %s681_s8 = inlined_call_operand.hbm [shape: f32[8,128], index: 8, kind: output, shape index: {}]  }
   0x1   :  { %15 = vsyncpa [#allocation7], 0 }
   0x2   :  { %16 = vsyncpa [#allocation10], 0 }
   0x3   :  { %17 = vsyncpa [#allocation5], 0  ;;  %s536_s27 = smov [#allocation6]   ;;  %s418_s9 = scalar_lea.hbm %s675_s2, 128 }
   0x4   :  { %s35_s28 = sshll.u32 %s536_s27, 4  ;;  %p419_p0 = scmp.ne.s32.totalorder %s675_s2, %s418_s9  ;;  %s36_s28 = int_to_ptr.vmem [resolvable:$true] %s35_s28 }
   0x5   :  { %p422_p1 = scmp.lt.u32.totalorder %s418_s9, %s675_s2 }
   0x7   :  { %p424_p2 = pnand %p422_p1, %p419_p0 }
   0x9   :  { %427 = shalt.err (!%p424_p2)
}
   0xa   :  { %s428_s14 = scalar_lea.vmem %s36_s28, 128  ;;  %p433_p4 = scmp.lt.s32.totalorder %s36_s28, %s36_s28 }
   0xb   :  { %p429_p3 = scmp.ne.s32.totalorder %s36_s28, %s428_s14  ;;  %p434_p5 = scmp.lt.s32.totalorder %s428_s14, %s428_s14 }
   0xd   :  { %p435_p6 = por %p434_p5, %p433_p4 }
   0xf   :  { %p436_p7 = pnand %p435_p6, %p429_p3 }
  0x11   :  { %439 = shalt.err (!%p436_p7)
}
  0x12   :  { %s537_s15 = smov 64   ;;  %s538_s16 = smov 4  }
  0x13   :  { %41 = dma.hbm_to_vmem [thread:$0]  %s675_s2, 128, %s36_s28, [#allocation7], %s537_s15, %s537_s15, %s538_s16  }
  0x14   :  { %s539_s19 = smov [#allocation3]   ;;  %s540_s21 = smov [#allocation8]  }
  0x15   :  { %s26_s20 = sshll.u32 %s539_s19, 4  ;;  %s49_s22 = sshll.u32 %s540_s21, 4  ;;  %s27_s20 = int_to_ptr.vmem [resolvable:$true] %s26_s20  ;;  %s50_s22 = int_to_ptr.vmem [resolvable:$true] %s49_s22 }
  0x16   :  { %s440_s25 = scalar_lea.hbm %s674_s1, 128 }
  0x17   :  { %p441_p8 = scmp.ne.s32.totalorder %s674_s1, %s440_s25  ;;  %p444_p9 = scmp.lt.u32.totalorder %s440_s25, %s674_s1 }
  0x19   :  { %p446_p10 = pnand %p444_p9, %p441_p8 }
  0x1b   :  { %449 = shalt.err (!%p446_p10)
}
  0x1c   :  { %s450_s2 = scalar_lea.vmem %s27_s20, 128  ;;  %p455_p12 = scmp.lt.s32.totalorder %s27_s20, %s27_s20 }
  0x1d   :  { %p451_p11 = scmp.ne.s32.totalorder %s27_s20, %s450_s2  ;;  %p456_p13 = scmp.lt.s32.totalorder %s450_s2, %s450_s2 }
  0x1f   :  { %p457_p0 = por %p456_p13, %p455_p12 }
  0x21   :  { %p458_p1 = pnand %p457_p0, %p451_p11 }
  0x23   :  { %461 = shalt.err (!%p458_p1)
}
  0x24   :  { %29 = dma.hbm_to_vmem [thread:$0]  %s674_s1, 128, %s27_s20, [#allocation4]  }
  0x25   :  { %s462_s12 = scalar_lea.hbm %s677_s4, 512 }
  0x26   :  { %p463_p2 = scmp.ne.s32.totalorder %s677_s4, %s462_s12  ;;  %p466_p3 = scmp.lt.u32.totalorder %s462_s12, %s677_s4 }
  0x28   :  { %p468_p4 = pnand %p466_p3, %p463_p2 }
  0x2a   :  { %471 = shalt.err (!%p468_p4)
}
  0x2b   :  { %s472_s19 = scalar_lea.vmem %s50_s22, 512  ;;  %p477_p6 = scmp.lt.s32.totalorder %s50_s22, %s50_s22 }
  0x2c   :  { %p473_p5 = scmp.ne.s32.totalorder %s50_s22, %s472_s19  ;;  %p478_p7 = scmp.lt.s32.totalorder %s472_s19, %s472_s19 }
  0x2e   :  { %p479_p8 = por %p478_p7, %p477_p6 }
  0x30   :  { %p480_p9 = pnand %p479_p8, %p473_p5 }
  0x32   :  { %483 = shalt.err (!%p480_p9)
}
  0x33   :  { %55 = dma.hbm_to_vmem [thread:$0]  %s677_s4, 512, %s50_s22, [#allocation7], %s537_s15, %s537_s15, %s538_s16  }
  0x34   :  { %s541_s21 = smov [#allocation9]   ;;  %s484_s26 = scalar_lea.hbm %s679_s6, 512 }
  0x35   :  { %s63_s23 = sshll.u32 %s541_s21, 4  ;;  %p485_p10 = scmp.ne.s32.totalorder %s679_s6, %s484_s26  ;;  %s64_s23 = int_to_ptr.vmem [resolvable:$true] %s63_s23 }
  0x36   :  { %p488_p11 = scmp.lt.u32.totalorder %s484_s26, %s679_s6 }
  0x38   :  { %p490_p12 = pnand %p488_p11, %p485_p10 }
  0x3a   :  { %493 = shalt.err (!%p490_p12)
}
  0x3b   :  { %s494_s28 = scalar_lea.vmem %s64_s23, 512  ;;  %p499_p0 = scmp.lt.s32.totalorder %s64_s23, %s64_s23 }
  0x3c   :  { %p495_p13 = scmp.ne.s32.totalorder %s64_s23, %s494_s28  ;;  %p500_p1 = scmp.lt.s32.totalorder %s494_s28, %s494_s28 }
  0x3e   :  { %p501_p2 = por %p500_p1, %p499_p0 }
  0x40   :  { %p502_p3 = pnand %p501_p2, %p495_p13 }
  0x42   :  { %505 = shalt.err (!%p502_p3)
}
  0x43   :  { %69 = dma.hbm_to_vmem [thread:$0]  %s679_s6, 512, %s64_s23, [#allocation10], %s537_s15, %s537_s15, %s538_s16  }
  0x44   :  { %528 = dma.done.wait [#allocation4], 128  }
  0x45   :  { %529 = vsyncadd [#allocation4], 4294967168 }
  0x46   :  { %530 = dma.done.wait [#allocation7], 640  }
  0x47   :  { %531 = vsyncadd [#allocation7], 4294966656 }
  0x48   :  { %532 = dma.done.wait [#allocation10], 512  }
  0x49   :  { %533 = vsyncadd [#allocation10], 4294966784  ;;  %v542_v0 = vmov 0.0   ;;  %vm543_vm0 = vmmov 0   ;;  %v403_v1 = vld [vmem:[#allocation6] sm:$0xff]   ;;  %v86_v2 = vld [vmem:[#allocation3] sm:$0xff]  ;;  %v317_v34 = vstv %s673_s0 }
  0x4a   :  { %364 = vmatprep.subr.bf16.mxu0 %v542_v0  ;;  %366 = vmatprep.mubr.msk.bf16.mxu0 %vm543_vm0, %v542_v0  ;;  %vm103_vm1 = vcmask 130048   ;;  %v87_v3 = vpack.c.bf16 %v86_v2, %v86_v2  ;;  %v404_v4 = vld [vmem:[#allocation8] sm:$0xff]   ;;  %v405_v5 = vld [vmem:[#allocation8 + $0x8] sm:$0xff]   ;;  %v406_v6 = vld [vmem:[#allocation8 + $0x10] sm:$0xff]   ;;  %vm188_vm2 = vcmask 523264   ;;  %s544_s12 = smov [#allocation11]  }
  0x4b   :  { %370 = vmatprep.subr.bf16.mxu1 %v542_v0  ;;  %378 = vmatprep.mubr.msk.bf16.mxu1 %vm543_vm0, %v542_v0  ;;  %v407_v7 = vld [vmem:[#allocation8 + $0x18] sm:$0xff]   ;;  %v337_v8 = vld [vmem:[%s676_s3] ss:$0 sm:$0xff]  ;;  %v408_v16 = vld [vmem:[#allocation9] sm:$0xff]   ;;  %s326_s13 = sshll.u32 %s544_s12, 4  ;;  %s327_s13 = int_to_ptr.vmem [resolvable:$true] %s326_s13 }
  0x4c   :  { %365 = vmatpush3.bf16.msra.mxu0 %v403_v1  ;;  %371 = vmatpush3.bf16.msra.mxu1 %v404_v4  ;;  %v409_v17 = vld [vmem:[#allocation9 + $0x8] sm:$0xff]   ;;  %v410_v18 = vld [vmem:[#allocation9 + $0x10] sm:$0xff]   ;;  %v411_v19 = vld [vmem:[#allocation9 + $0x18] sm:$0xff]   ;;  %s506_s14 = scalar_lea.vmem %s327_s13, 128  ;;  %p511_p5 = scmp.lt.s32.totalorder %s327_s13, %s327_s13 }
  0x4d   :  { %382 = vmatprep.subr.bf16.mxu0 %v542_v0  ;;  %372 = vmatprep.subr.bf16.mxu1 %v542_v0  ;;  %v340_v20 = vld [vmem:[%s678_s5] ss:$0 sm:$0xff]  ;;  %p507_p4 = scmp.ne.s32.totalorder %s327_s13, %s506_s14  ;;  %p512_p6 = scmp.lt.s32.totalorder %s506_s14, %s506_s14 }
  0x4e   :  { %v346_v28 = vld [vmem:[%s680_s7] ss:$0 sm:$0xff] }
  0x4f   :  { %367 = vmatmul.mubr.msk.bf16.vlgmr.msra.gmra.mrb[0].mxu0 %vm103_vm1, %v87_v3  ;;  %p513_p7 = por %p512_p6, %p511_p5 }
  0x50   :  { %390 = vmatprep.mubr.msk.bf16.mxu0 %vm543_vm0, %v542_v0  ;;  %373 = vmatpush3.bf16.msra.mxu1 %v405_v5 }
  0x51   :  { %374 = vmatprep.subr.bf16.mxu1 %v542_v0  ;;  %383 = vmatpush3.bf16.msra.mxu0 %v408_v16  ;;  %p514_p8 = pnand %p513_p7, %p507_p4 }
  0x52   :  { %384 = vmatprep.subr.bf16.mxu0 %v542_v0 }
  0x54   :  { %375 = vmatpush3.bf16.msra.mxu1 %v406_v6 }
  0x55   :  { %376 = vmatprep.subr.bf16.mxu1 %v542_v0  ;;  %385 = vmatpush3.bf16.msra.mxu0 %v409_v17 }
  0x56   :  { %386 = vmatprep.subr.bf16.mxu0 %v542_v0 }
  0x58   :  { %377 = vmatpush3.bf16.msra.mxu1 %v407_v7 }
  0x59   :  { %387 = vmatpush3.bf16.msra.mxu0 %v410_v18 }
  0x5a   :  { %388 = vmatprep.subr.bf16.mxu0 %v542_v0 }
  0x5d   :  { %389 = vmatpush3.bf16.msra.mxu0 %v411_v19 }
 0x122   :  { %v141_v9 = vpop.f32.mrb[0].mxu0 }
 0x123   :  { %v142_v10 = vadd.f32 %v337_v8, %v141_v9  ;;  %v368_v11 = vpop.f32.mrb[1].mxu0 }
 0x124   :  { %v144_v12 = vpop.f32.mrb[2].mxu0 }
 0x125   :  { %412 = vtanh.f32 %v142_v10  ;;  %v369_v13 = vpop.f32.mrb[3].mxu0 }
 0x12f   :  { %v413_v14 = vpop.eup %412 }
 0x130   :  { %v148_v15 = vpack.c.bf16 %v413_v14, %v413_v14 }
 0x132   :  { %379 = vmatmul.mubr.msk.bf16.vlgmr.msra.gmra.mrb[0].mxu1 %vm188_vm2, %v148_v15 }
 0x205   :  { %v226_v21 = vpop.f32.mrb[0].mxu1 }
 0x206   :  { %v227_v22 = vadd.f32 %v340_v20, %v226_v21  ;;  %v380_v23 = vpop.f32.mrb[1].mxu1 }
 0x207   :  { %v229_v24 = vpop.f32.mrb[2].mxu1 }
 0x208   :  { %414 = vtanh.f32 %v227_v22  ;;  %v381_v25 = vpop.f32.mrb[3].mxu1 }
 0x212   :  { %v415_v26 = vpop.eup %414 }
 0x213   :  { %v233_v27 = vpack.c.bf16 %v415_v26, %v415_v26 }
 0x215   :  { %391 = vmatmul.mubr.msk.bf16.vlgmr.msra.gmra.mrb[4].mxu0 %vm188_vm2, %v233_v27 }
 0x2e8   :  { %v310_v29 = vpop.f32.mrb[4].mxu0 }
 0x2e9   :  { %v311_v30 = vadd.f32 %v346_v28, %v310_v29  ;;  %v392_v31 = vpop.f32.mrb[5].mxu0 }
 0x2ea   :  { %v313_v32 = vpop.f32.mrb[6].mxu0 }
 0x2eb   :  { %416 = vtanh.f32 %v311_v30  ;;  %v393_v33 = vpop.f32.mrb[7].mxu0 }
 0x2f5   :  { %v417_v35 = vpop.eup %416 }
 0x2f6   :  { %v318_v36 = vmul.f32 %v417_v35, %v317_v34 }
 0x2f8   :  { %319 = vst [vmem:[#allocation11] sm:$0xff] %v318_v36 }
 0x2f9   :  { %517 = shalt.err (!%p514_p8)
}
 0x2fa   :  { %s518_s18 = scalar_lea.hbm %s681_s8, 128 }
 0x2fb   :  { %p519_p9 = scmp.ne.s32.totalorder %s681_s8, %s518_s18  ;;  %p522_p10 = scmp.lt.u32.totalorder %s518_s18, %s681_s8 }
 0x2fd   :  { %p524_p11 = pnand %p522_p10, %p519_p9 }
 0x2ff   :  { %527 = shalt.err (!%p524_p11)
}
 0x300   :  { %329 = dma.vmem_to_hbm [thread:$0]  %s327_s13, 128, %s681_s8, [#allocation5]  }
 0x301   :  { %534 = dma.done.wait [#allocation5], 128  }
 0x302   :  { %535 = vsyncadd [#allocation5], 4294967168 }
 0x303   :  { %333 = vsyncpa [#allocation4], 1 }
 0x304   :  { %334 = vsyncpa [#allocation7], 1 }
 0x305   :  { %335 = vsyncpa [#allocation10], 1 }
 0x306   :  { %336 = vsyncpa [#allocation5], 1 }

</bundles_post_ra>
